<compile_context>
chip_gen: v5e
topology: v5e:2x2
jax: 0.10.0
libtpu: 0.0.40
codegen_flags: <defaults>
</compile_context>

<pallas_src>
import jax
import jax.numpy as jnp
from jax.experimental import pallas as pl
from jax.experimental.pallas import tpu as pltpu


def _drop_path_kernel(x_ref, scale_ref, o_ref):
    # x_ref: (tb, tf)   scale_ref: (tb, 1) f32 (0.0 or 1/keep_rate)   o_ref: (tb, tf)
    # Pure VPU elementwise: per-row scale broadcast across the lane dimension.
    x = x_ref[...].astype(jnp.float32)
    o_ref[...] = (x * scale_ref[...]).astype(o_ref.dtype)


def _apply_row_scale(x2d, scale, *, tb_target=256, tf_target=2048):
    """x2d: (B, F), scale: (B, 1) f32. Returns x2d * scale (broadcast per row)."""
    B, F = x2d.shape

    # Row tile: multiple of 8 (16 for bf16 packing; 256 covers both) or the full dim.
    tb = min(B, tb_target) if (B % 8 == 0) else B
    # Column tile: lane-dense multiple of 128 when possible, else the full dim
    # (full-dim blocks are always legal w.r.t. the (8,128) constraint).
    tf = min(F, tf_target) if (F % 128 == 0) else F

    grid = (pl.cdiv(B, tb), pl.cdiv(F, tf))
    itemsize = jnp.dtype(x2d.dtype).itemsize
    cost = pl.CostEstimate(
        flops=B * F,                                   # one multiply per element
        transcendentals=0,
        bytes_accessed=2 * B * F * itemsize + B * 4,   # read x + write out + scale
    )

    return pl.pallas_call(
        _drop_path_kernel,
        out_shape=jax.ShapeDtypeStruct((B, F), x2d.dtype),
        grid_spec=pltpu.PrefetchScalarGridSpec(
            num_scalar_prefetch=0,
            grid=grid,
            in_specs=[
                pl.BlockSpec((tb, tf), lambda i, j: (i, j)),
                pl.BlockSpec((tb, 1), lambda i, j: (i, 0)),
            ],
            out_specs=pl.BlockSpec((tb, tf), lambda i, j: (i, j)),
        ),
        compiler_params=pltpu.CompilerParams(
            # Both axes are independent -> shard across TensorCores on v7x.
            # (At toy shapes the grid may collapse to a single step; that only
            # matters on multi-TC parts and is harmless here.)
            dimension_semantics=("parallel", "parallel"),
            vmem_limit_bytes=64 * 1024 * 1024,
        ),
        cost_estimate=cost,
    )(x2d, scale)


def drop_path(x, drop_rate: float = 0.0, training: bool = False, *, key=None):
    """JAX/Pallas equivalent of the PyTorch drop_path (stochastic depth).

    Matches the reference exactly:
      keep_rate = 1 - drop_rate
      random_tensor = floor(keep_rate + U[0,1))   per batch element
      out = x / keep_rate * random_tensor
    Identity when drop_rate == 0 or not training.
    """
    if drop_rate is None or drop_rate == 0.0 or not training:
        return x
    if key is None:
        raise ValueError("drop_path in training mode requires a PRNG key")

    keep_rate = 1.0 - drop_rate
    B = x.shape[0]

    # One Bernoulli(keep_rate) draw per batch element; floor(keep_rate + U) is
    # 1.0 iff U >= drop_rate.  This is B scalars -- computed in plain JAX so no
    # extra HBM traffic on the activation.
    u = jax.random.uniform(key, (B, 1), dtype=jnp.float32)
    random_tensor = jnp.floor(keep_rate + u)           # 0.0 or 1.0
    scale = random_tensor / keep_rate                  # 0.0 or 1/keep_rate

    F = 1
    for d in x.shape[1:]:
        F *= d
    x2d = x.reshape(B, F)                              # row-major view, no reshuffle
    out2d = _apply_row_scale(x2d, scale)
    return out2d.reshape(x.shape)


class DropPath:
    """Mirror of the PyTorch DropPath module (forward pass only)."""

    def __init__(self, drop_rate=None):
        self.drop_rate = drop_rate
        self.training = True

    def __call__(self, x, key=None):
        rate = 0.0 if self.drop_rate is None else self.drop_rate
        return drop_path(x, rate, self.training, key=key)


if __name__ == "__main__":
    # Small shapes consistent with a typical DropPath input: (B, C, H, W).
    B, C, Hs, Ws = 2, 4, 16, 16        # F = C*H*W = 1024 (lane-dense, 8x128 tiles)
    key = jax.random.PRNGKey(0)
    kx, kd = jax.random.split(key)

    x = jax.random.normal(kx, (B, C, Hs, Ws), dtype=jnp.float32)
    drop_rate = 0.25

    module = DropPath(drop_rate)

    # Training path: runs the Pallas kernel.
    module.training = True
    out = jax.block_until_ready(module(x, kd))

    # Eval path: exact identity, as in the PyTorch module.
    module.training = False
    out_eval = jax.block_until_ready(module(x, kd))
    assert jnp.array_equal(out_eval, x)

    # Reference check (PyTorch formula evaluated in plain JAX with the same draws).
    keep_rate = 1.0 - drop_rate
    u = jax.random.uniform(kd, (B, 1), dtype=jnp.float32)
    random_tensor = jnp.floor(keep_rate + u).reshape((B,) + (1,) * (x.ndim - 1))
    ref = x / keep_rate * random_tensor

    assert out.shape == x.shape, out.shape
    assert jnp.isfinite(out).all()
    assert jnp.allclose(out, ref, atol=1e-6, rtol=1e-6)

    print("KERNEL_OK")
</pallas_src>

<mosaic_0001>
module attributes {stable_mosaic.version = 11 : i64} {
  func.func @_drop_path_kernel(%arg0: i32, %arg1: i32, %arg2: memref<2x1024xf32, #tpu.memory_space<vmem>>, %arg3: memref<2x1xf32, #tpu.memory_space<vmem>>, %arg4: memref<2x1024xf32, #tpu.memory_space<vmem>>) attributes {dimension_semantics = [#tpu.dimension_semantics<parallel>, #tpu.dimension_semantics<parallel>], iteration_bounds = array<i64: 1, 1>, scalar_prefetch = 0 : i64, scratch_operands = 0 : i64, tpu.core_type = #tpu.core_type<tc>, window_params = [{transform_indices = @transform_0, window_bounds = array<i64: 2, 1024>}, {transform_indices = @transform_1, window_bounds = array<i64: 2, 1>}, {transform_indices = @transform_2, window_bounds = array<i64: 2, 1024>}]} {
    %c0 = arith.constant 0 : index
    %c0_0 = arith.constant 0 : index
    %0 = vector.load %arg2[%c0, %c0_0] : memref<2x1024xf32, #tpu.memory_space<vmem>>, vector<2x1024xf32>
    %c0_1 = arith.constant 0 : index
    %c0_2 = arith.constant 0 : index
    %1 = vector.load %arg3[%c0_1, %c0_2] : memref<2x1xf32, #tpu.memory_space<vmem>>, vector<2x1xf32>
    %2 = vector.broadcast %1 : vector<2x1xf32> to vector<2x1024xf32>
    %3 = arith.mulf %0, %2 : vector<2x1024xf32>
    %c0_3 = arith.constant 0 : index
    %c0_4 = arith.constant 0 : index
    %4 = vector.load %arg4[%c0_3, %c0_4] : memref<2x1024xf32, #tpu.memory_space<vmem>>, vector<2x1024xf32>
    tpu.vector_store %arg4[%c0_3, %c0_4], %3 {strides = array<i32>} : memref<2x1024xf32, #tpu.memory_space<vmem>>, vector<2x1024xf32>,
    return
  }
  func.func @transform_0(%arg0: i32, %arg1: i32) -> (i32, i32) {
    %c0_i32 = arith.constant 0 : i32
    return %arg0, %arg1 : i32, i32
  }
  func.func @transform_1(%arg0: i32, %arg1: i32) -> (i32, i32) {
    %c0_i32 = arith.constant 0 : i32
    %c0_i32_0 = arith.constant 0 : i32
    return %arg0, %c0_i32 : i32, i32
  }
  func.func @transform_2(%arg0: i32, %arg1: i32) -> (i32, i32) {
    %c0_i32 = arith.constant 0 : i32
    return %arg0, %arg1 : i32, i32
  }
}

</mosaic_0001>

<bundles_post_ra>
// kernel: tpu_custom_call.1
= control target key start
LH: loop header
LB: loop body
LE: loop exit
PB: predicated region body
PF: predicated region fallthrough
CT: control target
= control target key end

     0   :  { %7 = vsyncpa [#allocation3], 0  ;;  %s144_s0 = inlined_call_operand.hbm [shape: f32[2,1024], index: 0, kind: input, shape index: {}]   ;;  %s145_s1 = inlined_call_operand.vmem [shape: f32[2,1], index: 1, kind: input, shape index: {}]   ;;  %s146_s2 = inlined_call_operand.hbm [shape: f32[2,1024], index: 2, kind: output, shape index: {}]  }
   0x1   :  { %8 = vsyncpa [#allocation4], 0  ;;  %s14_s11 = sshll.u32 %s144_s0, 4  ;;  %s116_s12 = smov [#allocation2]   ;;  %s15_s11 = int_to_ptr.hbm [resolvable:$true] %s14_s11 }
   0x2   :  { %s16_s13 = sshll.u32 %s116_s12, 4  ;;  %s17_s13 = int_to_ptr.vmem [resolvable:$true] %s16_s13 }
   0x3   :  { %19 = dma.hbm_to_vmem [thread:$0]  %s15_s11, 256, %s17_s13, [#allocation3]  }
   0x4   :  { %112 = dma.done.wait [#allocation3], 256  }
   0x5   :  { %113 = vsyncadd [#allocation3], 4294967040  ;;  %v117_v0 = vmov 0   ;;  %v28_v1 = vld [vmem:[%s145_s1] sm:$0x3]  ;;  %v27_v7 = vld [vmem:[#allocation2 + $0x8] sm:$0xff] }
   0x6   :  { %63 = vset.pattern.permute.xlu0 %v117_v0  ;;  %v118_v2 = vmov 269488144   ;;  %v26_v6 = vld [vmem:[#allocation2] sm:$0xff]  ;;  %s119_s0 = smov [#allocation5]   ;;  %s49_s19 = sshll.u32 %s146_s2, 4  ;;  %s50_s19 = int_to_ptr.hbm [resolvable:$true] %s49_s19 }
   0x7   :  { %31 = vperm.xlu0 %63, %v28_v1   ;;  %v34_v3 = vunpack.c.l.s4 %v118_v2  ;;  %s47_s16 = sshll.u32 %s119_s0, 4  ;;  %s48_s16 = int_to_ptr.vmem [resolvable:$true] %s47_s16 }
   0x9   :  { %v35_v4 = vunpack.c.0.s8 %v34_v3 }
  0x79   :  { %v32_v5 = vpop.permute.xlu0 %31 }
  0x7a   :  { %v36_v8 = vperm.slane %v32_v5, %v35_v4 }
  0x7c   :  { %v38_v9 = vmul.f32 %v36_v8, %v26_v6  ;;  %v39_v10 = vmul.f32 %v36_v8, %v27_v7 }
  0x7e   :  { %40 = vst [vmem:[#allocation5] sm:$0xff] %v38_v9 }
  0x7f   :  { %41 = vst [vmem:[#allocation5 + $0x8] sm:$0xff] %v39_v10 }
  0x80   :  { %52 = dma.vmem_to_hbm [thread:$0]  %s48_s16, 256, %s50_s19, [#allocation4]  }
  0x81   :  { %114 = dma.done.wait [#allocation4], 256  }
  0x82   :  { %115 = vsyncadd [#allocation4], 4294967040 }
  0x83   :  { %57 = vsyncpa [#allocation3], 1 }
  0x84   :  { %58 = vsyncpa [#allocation4], 1 }

</bundles_post_ra>
